<compile_context>
chip_gen: v7x
topology: tpu7x:2x2x1
jax: 0.10.0
libtpu: 0.0.40
codegen_flags: <defaults>
</compile_context>

<pallas_src>
import functools

import jax
import jax.numpy as jnp
from jax.experimental import pallas as pl
from jax.experimental.pallas import tpu as pltpu


# ---------------------------------------------------------------------------
# Fused kernel: one-hot gather + linear + tanh + log_softmax (one batch tile)
# ---------------------------------------------------------------------------
def _ngram_fused_kernel(idx_ref, emb_ref, w_ref, b_ref, o_ref, *,
                        valid_v, context_size):
    # idx_ref : VMEM (Bt, C)      int32  context word ids for this batch tile
    # emb_ref : VMEM (Vp, Dp)     f32    padded embedding table (resident)
    # w_ref   : VMEM (C, Dp, Vp)  f32    padded linear1 weight  (resident)
    # b_ref   : VMEM (1, Vp)      f32    padded linear1 bias    (resident)
    # o_ref   : VMEM (Bt, Vp)     f32    log-probs (padded lanes hold -inf)
    bt, vp = o_ref.shape
    vpe = emb_ref.shape[0]

    idx = idx_ref[...]                                             # (Bt, C)
    emb = emb_ref[...]                                             # (Vp, Dp)
    voc_iota = jax.lax.broadcasted_iota(jnp.int32, (bt, vpe), 1)

    # linear1(embeds.view(B, -1)) == sum_c onehot(idx[:, c]) @ emb @ W_c + b
    acc = jnp.broadcast_to(b_ref[...], (bt, vp)).astype(jnp.float32)
    for c in range(context_size):                  # static unroll, C is small
        onehot = (idx[:, c:c + 1] == voc_iota).astype(emb.dtype)   # (Bt, Vp)
        x_c = jnp.dot(onehot, emb,
                      preferred_element_type=jnp.float32)          # (Bt, Dp)
        acc = acc + jnp.dot(x_c, w_ref[c],
                            preferred_element_type=jnp.float32)    # (Bt, Vp)

    out = jnp.tanh(acc)                                            # EUP, f32

    # Numerically-stable log_softmax over the valid vocab lanes only; padded
    # lanes are masked to -inf so the max / exp-sum normalizer is exact.
    lane = jax.lax.broadcasted_iota(jnp.int32, (bt, vp), 1)
    masked = jnp.where(lane < valid_v, out, -jnp.inf)
    m = jnp.max(masked, axis=-1, keepdims=True)
    lse = m + jnp.log(jnp.sum(jnp.exp(masked - m), axis=-1, keepdims=True))
    o_ref[...] = (masked - lse).astype(o_ref.dtype)


# ---------------------------------------------------------------------------
# One-time parameter preparation (hoisted out of the per-step forward)
# ---------------------------------------------------------------------------
def init_ngram_params(emb_table, w, b):
    """emb_table: (V, D) f32; w: (C*D, V) f32 -- the (in, out) transpose of
    nn.Linear's (out, in) weight; b: (V,) or (1, V) f32."""
    V, D = emb_table.shape
    CD, V2 = w.shape
    assert V2 == V and CD % D == 0
    C = CD // D
    b = jnp.asarray(b, jnp.float32).reshape(1, V)

    Dp = pl.cdiv(D, 64) * 64          # sublane-friendly D   (50  -> 64)
    Vp = pl.cdiv(V, 128) * 128        # lane-dense vocab     (100 -> 128)

    # NOTE: for vocab-scaled / batched training runs, store emb_p / w3 in
    # bf16 (f32 accumulation is already forced in-kernel); irrelevant here.
    emb_p = jnp.pad(jnp.asarray(emb_table, jnp.float32),
                    ((0, Vp - V), (0, Dp - D)))
    w3 = jnp.pad(jnp.asarray(w, jnp.float32).reshape(C, D, V),
                 ((0, 0), (0, Dp - D), (0, Vp - V)))
    b_p = jnp.pad(b, ((0, 0), (0, Vp - V)))
    return dict(emb=emb_p, w=w3, b=b_p, V=V, C=C, Dp=Dp, Vp=Vp)


# ---------------------------------------------------------------------------
# Forward: (C,) -> (1, V)  [module-faithful]   or   (B, C) -> (B, V)  [batched]
# ---------------------------------------------------------------------------
def ngram_lm_forward(inputs, params, *, batch_tile=128):
    emb_p, w3, b_p = params["emb"], params["w"], params["b"]
    V, C, Dp, Vp = params["V"], params["C"], params["Dp"], params["Vp"]

    single = inputs.ndim == 1
    idx = inputs.reshape(1, -1) if single else inputs
    idx = idx.astype(jnp.int32)
    B = idx.shape[0]
    assert idx.shape[1] == C

    # Tile the batch into `batch_tile`-row MXU tiles; tiny batches are padded
    # up to a sublane multiple (pad rows use word id 0 and are sliced off).
    bt = min(batch_tile, pl.cdiv(B, 8) * 8)
    Bp = pl.cdiv(B, bt) * bt
    if Bp != B:
        idx = jnp.pad(idx, ((0, Bp - B), (0, 0)))

    kernel = functools.partial(_ngram_fused_kernel, valid_v=V, context_size=C)

    out_p = pl.pallas_call(
        kernel,
        out_shape=jax.ShapeDtypeStruct((Bp, Vp), jnp.float32),
        grid=(Bp // bt,),
        in_specs=[
            pl.BlockSpec((bt, C), lambda i: (i, 0)),         # index tile
            pl.BlockSpec((Vp, Dp), lambda i: (0, 0)),        # whole emb table
            pl.BlockSpec((C, Dp, Vp), lambda i: (0, 0, 0)),  # whole weight
            pl.BlockSpec((1, Vp), lambda i: (0, 0)),         # bias
        ],
        out_specs=pl.BlockSpec((bt, Vp), lambda i: (i, 0)),
        # Batch tiles are independent -> "parallel" lets v7x's 2 TCs split them.
        compiler_params=pltpu.CompilerParams(
            dimension_semantics=("parallel",)),
    )(idx, emb_p, w3, b_p)

    # TODO(synk): consumers that tolerate the Vp-wide (-inf padded) buffer can
    # take `out_p` directly and skip this slice; single-buffering the resident
    # params (pl.Buffered(1)) only matters once V is scaled up.
    return out_p[:B, :V]


# ---------------------------------------------------------------------------
# Pure-JAX reference (mirrors the PyTorch module, vmapped over the batch)
# ---------------------------------------------------------------------------
def _reference(idx_bc, emb_table, w, b):
    embeds = jnp.take(emb_table, idx_bc, axis=0).reshape(idx_bc.shape[0], -1)
    out = jnp.tanh(embeds @ w + b.reshape(1, -1))
    return jax.nn.log_softmax(out, axis=-1)


if __name__ == "__main__":
    VOCAB_SIZE = 100
    EMBEDDING_DIM = 50
    CONTEXT_SIZE = 3
    BATCH = 256                      # batched demo: two 128-row MXU tiles

    key = jax.random.PRNGKey(0)
    k_emb, k_w, k_b, k_idx1, k_idx2 = jax.random.split(key, 5)

    # Deterministic "pretrained" embedding matrix (frozen in the torch module).
    word_embeddings = jax.random.normal(
        k_emb, (VOCAB_SIZE, EMBEDDING_DIM), dtype=jnp.float32)

    # linear1: in = C*D, out = V.  Stored already transposed to (in, out).
    in_features = CONTEXT_SIZE * EMBEDDING_DIM
    w = jax.random.normal(k_w, (in_features, VOCAB_SIZE), jnp.float32) * 0.05
    b = jax.random.normal(k_b, (1, VOCAB_SIZE), jnp.float32) * 0.05

    params = init_ngram_params(word_embeddings, w, b)   # one-time padding

    # 1) Module-faithful single context window: (C,) -> (1, V)
    inputs = jax.random.randint(
        k_idx1, (CONTEXT_SIZE,), 0, VOCAB_SIZE, dtype=jnp.int32)
    lp1 = jax.block_until_ready(ngram_lm_forward(inputs, params))
    ref1 = _reference(inputs[None, :], word_embeddings, w, b)
    assert lp1.shape == (1, VOCAB_SIZE)
    assert jnp.allclose(lp1, ref1, atol=1e-4, rtol=1e-4)

    # 2) Batched path (the perf lever): (B, C) -> (B, V)
    batch_idx = jax.random.randint(
        k_idx2, (BATCH, CONTEXT_SIZE), 0, VOCAB_SIZE, dtype=jnp.int32)
    lp2 = jax.block_until_ready(ngram_lm_forward(batch_idx, params))
    ref2 = _reference(batch_idx, word_embeddings, w, b)
    assert lp2.shape == (BATCH, VOCAB_SIZE)
    assert jnp.allclose(lp2, ref2, atol=1e-4, rtol=1e-4)

    print("KERNEL_OK")
</pallas_src>

<mosaic_0001>
module attributes {stable_mosaic.version = 11 : i64} {
  func.func @_ngram_fused_kernel(%arg0: i32, %arg1: memref<8x3xi32, #tpu.memory_space<vmem>>, %arg2: memref<128x64xf32, #tpu.memory_space<vmem>>, %arg3: memref<3x64x128xf32, #tpu.memory_space<vmem>>, %arg4: memref<1x128xf32, #tpu.memory_space<vmem>>, %arg5: memref<8x128xf32, #tpu.memory_space<vmem>>) attributes {dimension_semantics = [#tpu.dimension_semantics<parallel>], iteration_bounds = array<i64: 1>, scalar_prefetch = 0 : i64, scratch_operands = 0 : i64, tpu.core_type = #tpu.core_type<tc>, window_params = [{transform_indices = @transform_0, window_bounds = array<i64: 8, 3>}, {pipeline_mode = #tpu.pipeline_mode<synchronous>, transform_indices = @transform_1, window_bounds = array<i64: 128, 64>}, {pipeline_mode = #tpu.pipeline_mode<synchronous>, transform_indices = @transform_2, window_bounds = array<i64: 3, 64, 128>}, {pipeline_mode = #tpu.pipeline_mode<synchronous>, transform_indices = @transform_3, window_bounds = array<i64: 1, 128>}, {transform_indices = @transform_4, window_bounds = array<i64: 8, 128>}]} {
    %c0 = arith.constant 0 : index
    %c0_0 = arith.constant 0 : index
    %0 = vector.load %arg1[%c0, %c0_0] : memref<8x3xi32, #tpu.memory_space<vmem>>, vector<8x3xi32>
    %c0_1 = arith.constant 0 : index
    %c0_2 = arith.constant 0 : index
    %1 = vector.load %arg2[%c0_1, %c0_2] : memref<128x64xf32, #tpu.memory_space<vmem>>, vector<128x64xf32>
    %2 = tpu.iota {dimensions = array<i32: 1>} : vector<8x128xi32>
    %c0_3 = arith.constant 0 : index
    %c0_4 = arith.constant 0 : index
    %3 = vector.load %arg4[%c0_3, %c0_4] : memref<1x128xf32, #tpu.memory_space<vmem>>, vector<1x128xf32>
    %4 = vector.shape_cast %3 : vector<1x128xf32> to vector<1x128xf32>
    %5 = vector.broadcast %4 : vector<1x128xf32> to vector<8x128xf32>
    %6 = vector.extract_strided_slice %0 {offsets = [0, 0], sizes = [8, 1], strides = [1, 1]} : vector<8x3xi32> to vector<8x1xi32>
    %7 = vector.broadcast %6 : vector<8x1xi32> to vector<8x128xi32>
    %8 = arith.cmpi eq, %7, %2 : vector<8x128xi32>
    %9 = arith.extui %8 : vector<8x128xi1> to vector<8x128xi32>
    %10 = arith.sitofp %9 : vector<8x128xi32> to vector<8x128xf32>
    %cst = arith.constant dense<0.000000e+00> : vector<8x64xf32>
    %11 = tpu.matmul %10, %1, %cst {dimension_numbers = #tpu.dot_dimension_numbers<[1], [0], [0], [1], [0, 0, 1, 1], [], []>} : vector<8x128xf32>, vector<128x64xf32>, vector<8x64xf32> -> vector<8x64xf32>
    %c0_5 = arith.constant 0 : index
    %c0_6 = arith.constant 0 : index
    %c0_7 = arith.constant 0 : index
    %12 = vector.load %arg3[%c0_5, %c0_6, %c0_7] : memref<3x64x128xf32, #tpu.memory_space<vmem>>, vector<1x64x128xf32>
    %13 = vector.shape_cast %12 : vector<1x64x128xf32> to vector<64x128xf32>
    %cst_8 = arith.constant dense<0.000000e+00> : vector<8x128xf32>
    %14 = tpu.matmul %11, %13, %cst_8 {dimension_numbers = #tpu.dot_dimension_numbers<[1], [0], [0], [1], [0, 0, 1, 1], [], []>} : vector<8x64xf32>, vector<64x128xf32>, vector<8x128xf32> -> vector<8x128xf32>
    %15 = arith.addf %5, %14 : vector<8x128xf32>
    %16 = vector.extract_strided_slice %0 {offsets = [0, 1], sizes = [8, 1], strides = [1, 1]} : vector<8x3xi32> to vector<8x1xi32>
    %17 = vector.broadcast %16 : vector<8x1xi32> to vector<8x128xi32>
    %18 = arith.cmpi eq, %17, %2 : vector<8x128xi32>
    %19 = arith.extui %18 : vector<8x128xi1> to vector<8x128xi32>
    %20 = arith.sitofp %19 : vector<8x128xi32> to vector<8x128xf32>
    %cst_9 = arith.constant dense<0.000000e+00> : vector<8x64xf32>
    %21 = tpu.matmul %20, %1, %cst_9 {dimension_numbers = #tpu.dot_dimension_numbers<[1], [0], [0], [1], [0, 0, 1, 1], [], []>} : vector<8x128xf32>, vector<128x64xf32>, vector<8x64xf32> -> vector<8x64xf32>
    %c1 = arith.constant 1 : index
    %c0_10 = arith.constant 0 : index
    %c0_11 = arith.constant 0 : index
    %22 = vector.load %arg3[%c1, %c0_10, %c0_11] : memref<3x64x128xf32, #tpu.memory_space<vmem>>, vector<1x64x128xf32>
    %23 = vector.shape_cast %22 : vector<1x64x128xf32> to vector<64x128xf32>
    %cst_12 = arith.constant dense<0.000000e+00> : vector<8x128xf32>
    %24 = tpu.matmul %21, %23, %cst_12 {dimension_numbers = #tpu.dot_dimension_numbers<[1], [0], [0], [1], [0, 0, 1, 1], [], []>} : vector<8x64xf32>, vector<64x128xf32>, vector<8x128xf32> -> vector<8x128xf32>
    %25 = arith.addf %15, %24 : vector<8x128xf32>
    %26 = vector.extract_strided_slice %0 {offsets = [0, 2], sizes = [8, 1], strides = [1, 1]} : vector<8x3xi32> to vector<8x1xi32>
    %27 = vector.broadcast %26 : vector<8x1xi32> to vector<8x128xi32>
    %28 = arith.cmpi eq, %27, %2 : vector<8x128xi32>
    %29 = arith.extui %28 : vector<8x128xi1> to vector<8x128xi32>
    %30 = arith.sitofp %29 : vector<8x128xi32> to vector<8x128xf32>
    %cst_13 = arith.constant dense<0.000000e+00> : vector<8x64xf32>
    %31 = tpu.matmul %30, %1, %cst_13 {dimension_numbers = #tpu.dot_dimension_numbers<[1], [0], [0], [1], [0, 0, 1, 1], [], []>} : vector<8x128xf32>, vector<128x64xf32>, vector<8x64xf32> -> vector<8x64xf32>
    %c2 = arith.constant 2 : index
    %c0_14 = arith.constant 0 : index
    %c0_15 = arith.constant 0 : index
    %32 = vector.load %arg3[%c2, %c0_14, %c0_15] : memref<3x64x128xf32, #tpu.memory_space<vmem>>, vector<1x64x128xf32>
    %33 = vector.shape_cast %32 : vector<1x64x128xf32> to vector<64x128xf32>
    %cst_16 = arith.constant dense<0.000000e+00> : vector<8x128xf32>
    %34 = tpu.matmul %31, %33, %cst_16 {dimension_numbers = #tpu.dot_dimension_numbers<[1], [0], [0], [1], [0, 0, 1, 1], [], []>} : vector<8x64xf32>, vector<64x128xf32>, vector<8x128xf32> -> vector<8x128xf32>
    %35 = arith.addf %25, %34 : vector<8x128xf32>
    %36 = math.tanh %35 : vector<8x128xf32>
    %37 = tpu.iota {dimensions = array<i32: 1>} : vector<8x128xi32>
    %c100_i32 = arith.constant 100 : i32
    %38 = vector.broadcast %c100_i32 : i32 to vector<8x128xi32>
    %39 = arith.cmpi slt, %37, %38 : vector<8x128xi32>
    %cst_17 = arith.constant 0xFF800000 : f32
    %40 = vector.broadcast %cst_17 : f32 to vector<8x128xf32>
    %41 = arith.select %39, %36, %40 : vector<8x128xi1>, vector<8x128xf32>
    %cst_18 = arith.constant dense<0xFF800000> : vector<8xf32>
    %42 = vector.multi_reduction <maximumf>, %41, %cst_18 [1] : vector<8x128xf32> to vector<8xf32>
    %43 = vector.shape_cast %42 : vector<8xf32> to vector<8x1xf32>
    %44 = vector.broadcast %43 : vector<8x1xf32> to vector<8x128xf32>
    %45 = arith.subf %41, %44 : vector<8x128xf32>
    %46 = math.exp %45 : vector<8x128xf32>
    %cst_19 = arith.constant dense<0.000000e+00> : vector<8xf32>
    %47 = vector.multi_reduction <add>, %46, %cst_19 [1] : vector<8x128xf32> to vector<8xf32>
    %48 = vector.shape_cast %47 : vector<8xf32> to vector<8x1xf32>
    %49 = math.log %48 : vector<8x1xf32>
    %50 = arith.addf %43, %49 : vector<8x1xf32>
    %51 = vector.broadcast %50 : vector<8x1xf32> to vector<8x128xf32>
    %52 = arith.subf %41, %51 : vector<8x128xf32>
    %c0_20 = arith.constant 0 : index
    %c0_21 = arith.constant 0 : index
    %53 = vector.load %arg5[%c0_20, %c0_21] : memref<8x128xf32, #tpu.memory_space<vmem>>, vector<8x128xf32>
    tpu.vector_store %arg5[%c0_20, %c0_21], %52 {strides = array<i32>} : memref<8x128xf32, #tpu.memory_space<vmem>>, vector<8x128xf32>,
    return
  }
  func.func @transform_0(%arg0: i32) -> (i32, i32) {
    %c0_i32 = arith.constant 0 : i32
    %c0_i32_0 = arith.constant 0 : i32
    return %arg0, %c0_i32 : i32, i32
  }
  func.func @transform_1(%arg0: i32) -> (i32, i32) {
    %c0_i32 = arith.constant 0 : i32
    %c0_i32_0 = arith.constant 0 : i32
    %c0_i32_1 = arith.constant 0 : i32
    return %c0_i32, %c0_i32_0 : i32, i32
  }
  func.func @transform_2(%arg0: i32) -> (i32, i32, i32) {
    %c0_i32 = arith.constant 0 : i32
    %c0_i32_0 = arith.constant 0 : i32
    %c0_i32_1 = arith.constant 0 : i32
    %c0_i32_2 = arith.constant 0 : i32
    return %c0_i32, %c0_i32_0, %c0_i32_1 : i32, i32, i32
  }
  func.func @transform_3(%arg0: i32) -> (i32, i32) {
    %c0_i32 = arith.constant 0 : i32
    %c0_i32_0 = arith.constant 0 : i32
    %c0_i32_1 = arith.constant 0 : i32
    return %c0_i32, %c0_i32_0 : i32, i32
  }
  func.func @transform_4(%arg0: i32) -> (i32, i32) {
    %c0_i32 = arith.constant 0 : i32
    %c0_i32_0 = arith.constant 0 : i32
    return %arg0, %c0_i32 : i32, i32
  }
}

</mosaic_0001>

<bundles_post_ra>
// kernel: tpu_custom_call.1
= control target key start
LH: loop header
LB: loop body
LE: loop exit
PB: predicated region body
PF: predicated region fallthrough
CT: control target
= control target key end

     0   :  { %v971_v3 = vmov 0   ;;  %v972_v4 = vmov 0.0|0.0   ;;  %vm973_vm0 = vmmov 0   ;;  %v974_v8 = vmov 0.0   ;;  %s1219_s0 = inlined_call_operand.vmem [shape: s32[8,3], index: 0, kind: input, shape index: {}]   ;;  %s1220_s1 = inlined_call_operand.vmem [shape: f32[128,64], index: 1, kind: input, shape index: {}]   ;;  %s1221_s2 = inlined_call_operand.vmem [shape: f32[3,64,128], index: 2, kind: input, shape index: {}]   ;;  %s1222_s3 = inlined_call_operand.vmem [shape: f32[1,128], index: 3, kind: input, shape index: {}]   ;;  %s1223_s4 = inlined_call_operand.hbm [shape: f32[8,128], index: 4, kind: output, shape index: {}]  }
   0x1   :  { %v18_v0 = vld [vmem:[%s1219_s0] sm:$0xff]  ;;  %v20_v2 = vld [vmem:[%s1220_s1 + $0x8] sm:$0xff]  ;;  %937 = vset.pattern.permute.xlu0 %v971_v3  ;;  %816 = vmatprep.subr.bf16.mxu0 %v972_v4  ;;  %v21_v6 = vld [vmem:[%s1220_s1 + $0x10] sm:$0xff]  ;;  %v975_v12 = vmov 2   ;;  %v976_v14 = vmov 1  }
   0x2   :  { %v19_v1 = vld [vmem:[%s1220_s1] sm:$0xff]  ;;  %v22_v7 = vld [vmem:[%s1220_s1 + $0x18] sm:$0xff]  ;;  %45 = vperm.xlu0 %937, %v18_v0   ;;  %686 = vmatprep.mubr.msk.f32.mxu0 %vm973_vm0, %v974_v8  ;;  %v24_v11 = vld [vmem:[%s1220_s1 + $0x28] sm:$0xff] }
   0x3   :  { %v1014_v5 = vpack.c.bf16 %v20_v2, %v19_v1  ;;  %v1025_v9 = vpack.c.bf16 %v22_v7, %v21_v6  ;;  %840 = vmatprep.subr.bf16.mxu1 %v972_v4  ;;  %v23_v10 = vld [vmem:[%s1220_s1 + $0x20] sm:$0xff]  ;;  %939 = vset.pattern.permute.xlu1 %v975_v12  ;;  %v121_v15 = vld [vmem:[%s1221_s2 + $0x8] sm:$0xff]  ;;  %v122_v16 = vld [vmem:[%s1221_s2 + $0x10] sm:$0xff] }
   0x4   :  { %363 = vperm.xlu1 %939, %v18_v0   ;;  %v120_v13 = vld [vmem:[%s1221_s2] sm:$0xff]  ;;  %705 = vmatprep.mubr.msk.f32.mxu1 %vm973_vm0, %v974_v8  ;;  %v123_v17 = vld [vmem:[%s1221_s2 + $0x18] sm:$0xff]  ;;  %v1050_v18 = vpack.c.bf16 %v24_v11, %v23_v10  ;;  %v25_v20 = vld [vmem:[%s1220_s1 + $0x30] sm:$0xff] }
   0x5   :  { %818 = vmatpush3.bf16.msra.mxu0 %v1014_v5  ;;  %v841_v19 = vpack.c.bf16 %v121_v15, %v120_v13  ;;  %v26_v21 = vld [vmem:[%s1220_s1 + $0x38] sm:$0xff] }
   0x6   :  { %819 = vmatprep.subr.bf16.mxu0 %v972_v4  ;;  %938 = vset.pattern.permute.xlu0 %v976_v14 }
   0x7   :  { %204 = vperm.xlu0 %938, %v18_v0  }
   0x9   :  { %821 = vmatpush3.bf16.msra.mxu0 %v1025_v9 }
   0xa   :  { %822 = vmatprep.subr.bf16.mxu0 %v972_v4 }
   0xb   :  { %9 = vsyncpa [#allocation3], 0  ;;  %842 = vmatpush3.bf16.msra.mxu1 %v841_v19  ;;  %v844_v22 = vpack.c.bf16 %v123_v17, %v122_v16  ;;  %v124_v23 = vld [vmem:[%s1221_s2 + $0x20] sm:$0xff]  ;;  %v125_v24 = vld [vmem:[%s1221_s2 + $0x28] sm:$0xff]  ;;  %v1067_v25 = vpack.c.bf16 %v26_v21, %v25_v20  ;;  %940 = vset.pattern.permute.xlu0 %v975_v12  ;;  %v35_v42 = vlaneseq  ;;  %v977_v45 = vmov 1.0  }
   0xc   :  { %843 = vmatprep.subr.bf16.mxu1 %v972_v4  ;;  %v27_v26 = vld [vmem:[%s1220_s1 + $0x40] sm:$0xff]  ;;  %v28_v27 = vld [vmem:[%s1220_s1 + $0x48] sm:$0xff]  ;;  %v847_v28 = vpack.c.bf16 %v125_v24, %v124_v23  ;;  %v126_v29 = vld [vmem:[%s1221_s2 + $0x30] sm:$0xff]  ;;  %vm128_vm3 = vcmask 523264  }
   0xd   :  { %824 = vmatpush3.bf16.msra.mxu0 %v1050_v18  ;;  %v127_v30 = vld [vmem:[%s1221_s2 + $0x38] sm:$0xff]  ;;  %v829_v31 = vpack.c.bf16 %v28_v27, %v27_v26  ;;  %v29_v32 = vld [vmem:[%s1220_s1 + $0x50] sm:$0xff]  ;;  %v31_v36 = vld [vmem:[%s1220_s1 + $0x60] sm:$0xff]  ;;  %v1109_v43 = vand.u32 127, %v35_v42 }
   0xe   :  { %825 = vmatprep.subr.bf16.mxu0 %v972_v4  ;;  %v30_v33 = vld [vmem:[%s1220_s1 + $0x58] sm:$0xff]  ;;  %v850_v34 = vpack.c.bf16 %v127_v30, %v126_v29  ;;  %v32_v37 = vld [vmem:[%s1220_s1 + $0x68] sm:$0xff]  ;;  %v33_v39 = vld [vmem:[%s1220_s1 + $0x70] sm:$0xff] }
   0xf   :  { %845 = vmatpush3.bf16.msra.mxu1 %v844_v22  ;;  %v832_v35 = vpack.c.bf16 %v30_v33, %v29_v32  ;;  %v835_v38 = vpack.c.bf16 %v32_v37, %v31_v36  ;;  %v34_v40 = vld [vmem:[%s1220_s1 + $0x78] sm:$0xff]  ;;  %v556_v50 = vld [vmem:[%s1221_s2 + $0x40] sm:$0xff]  ;;  %v557_v51 = vld [vmem:[%s1221_s2 + $0x48] sm:$0xff]  ;;  %vm522_vm5 = vcmp.lt.s32.totalorder %v1109_v43, 100 }
  0x10   :  { %846 = vmatprep.subr.bf16.mxu1 %v972_v4  ;;  %v838_v41 = vpack.c.bf16 %v34_v40, %v33_v39  ;;  %v877_v52 = vpack.c.bf16 %v557_v51, %v556_v50  ;;  %v558_v53 = vld [vmem:[%s1221_s2 + $0x50] sm:$0xff]  ;;  %v559_v54 = vld [vmem:[%s1221_s2 + $0x58] sm:$0xff]  ;;  %v560_v56 = vld [vmem:[%s1221_s2 + $0x60] sm:$0xff] }
  0x11   :  { %827 = vmatpush3.bf16.msra.mxu0 %v1067_v25  ;;  %v880_v55 = vpack.c.bf16 %v559_v54, %v558_v53  ;;  %v561_v57 = vld [vmem:[%s1221_s2 + $0x68] sm:$0xff]  ;;  %v562_v59 = vld [vmem:[%s1221_s2 + $0x70] sm:$0xff]  ;;  %v563_v60 = vld [vmem:[%s1221_s2 + $0x78] sm:$0xff] }
  0x12   :  { %828 = vmatprep.subr.bf16.mxu0 %v972_v4  ;;  %v883_v58 = vpack.c.bf16 %v561_v57, %v560_v56  ;;  %v886_v61 = vpack.c.bf16 %v563_v60, %v562_v59  ;;  %v567_v0 = vld [vmem:[%s1221_s2 + $0x80] sm:$0xff]  ;;  %v568_v1 = vld [vmem:[%s1221_s2 + $0x88] sm:$0xff]  ;;  %v569_v3 = vld [vmem:[%s1221_s2 + $0x90] sm:$0xff] }
  0x13   :  { %848 = vmatpush3.bf16.msra.mxu1 %v847_v28  ;;  %v913_v2 = vpack.c.bf16 %v568_v1, %v567_v0  ;;  %v571_v10 = vld [vmem:[%s1221_s2 + $0xa0] sm:$0xff]  ;;  %v572_v11 = vld [vmem:[%s1221_s2 + $0xa8] sm:$0xff]  ;;  %v573_v13 = vld [vmem:[%s1221_s2 + $0xb0] sm:$0xff] }
  0x14   :  { %849 = vmatprep.subr.bf16.mxu1 %v972_v4  ;;  %v919_v12 = vpack.c.bf16 %v572_v11, %v571_v10  ;;  %v550_v15 = vld [vmem:[%s1222_s3] ss:$0 sm:$0xff] }
  0x15   :  { %830 = vmatpush3.bf16.msra.mxu0 %v829_v31 }
  0x16   :  { %831 = vmatprep.subr.bf16.mxu0 %v972_v4 }
  0x17   :  { %851 = vmatpush3.bf16.msra.mxu1 %v850_v34 }
  0x18   :  { %852 = vmatprep.subr.bf16.mxu1 %v972_v4 }
  0x19   :  { %833 = vmatpush3.bf16.msra.mxu0 %v832_v35 }
  0x1a   :  { %834 = vmatprep.subr.bf16.mxu0 %v972_v4 }
  0x1d   :  { %836 = vmatpush3.bf16.msra.mxu0 %v835_v38 }
  0x1e   :  { %837 = vmatprep.subr.bf16.mxu0 %v972_v4 }
  0x21   :  { %839 = vmatpush3.bf16.msra.mxu0 %v838_v41 }
  0x22   :  { %888 = vmatprep.subr.bf16.mxu0 %v972_v4 }
  0x81   :  { %v46_v44 = vpop.permute.xlu0 %45 }
  0x82   :  { %vm47_vm1 = vcmp.eq.s32.totalorder %v46_v44, %v1109_v43 }
  0x83   :  { %687 = vmatmul.mubr.msk.f32.vlgmr.msra.gmra.mrb[0].mxu0 %vm47_vm1, %v977_v45  ;;  %v364_v46 = vpop.permute.xlu1 %363 }
  0x84   :  { %890 = vmatpush3.bf16.msra.mxu0 %v1014_v5  ;;  %794 = vmatprep.mubr.msk.f32.mxu0 %vm973_vm0, %v974_v8  ;;  %vm365_vm2 = vcmp.eq.s32.totalorder %v364_v46, %v1109_v43 }
  0x85   :  { %891 = vmatprep.subr.bf16.mxu0 %v972_v4 }
  0x86   :  { %v205_v49 = vpop.permute.xlu0 %204 }
  0x87   :  { %vm206_vm4 = vcmp.eq.s32.totalorder %v205_v49, %v1109_v43 }
  0x88   :  { %893 = vmatpush3.bf16.msra.mxu0 %v1025_v9 }
  0x89   :  { %894 = vmatprep.subr.bf16.mxu0 %v972_v4 }
  0x8c   :  { %896 = vmatpush3.bf16.msra.mxu0 %v1050_v18 }
  0x8d   :  { %897 = vmatprep.subr.bf16.mxu0 %v972_v4 }
  0x90   :  { %899 = vmatpush3.bf16.msra.mxu0 %v1067_v25 }
  0x91   :  { %900 = vmatprep.subr.bf16.mxu0 %v972_v4 }
  0x94   :  { %902 = vmatpush3.bf16.msra.mxu0 %v829_v31 }
  0x95   :  { %903 = vmatprep.subr.bf16.mxu0 %v972_v4 }
  0x98   :  { %905 = vmatpush3.bf16.msra.mxu0 %v832_v35 }
  0x99   :  { %906 = vmatprep.subr.bf16.mxu0 %v972_v4 }
  0x9c   :  { %908 = vmatpush3.bf16.msra.mxu0 %v835_v38 }
  0x9d   :  { %909 = vmatprep.subr.bf16.mxu0 %v972_v4 }
  0xa0   :  { %911 = vmatpush3.bf16.msra.mxu0 %v838_v41 }
  0xa3   :  { %795 = vmatmul.mubr.msk.f32.vlgmr.msra.gmra.mrb[2].mxu0 %vm365_vm2, %v977_v45 }
 0x156   :  { %v116_v47 = vpop.f32.mrb[0].mxu0 }
 0x157   :  { %v688_v48 = vpop.f32.mrb[1].mxu0  ;;  %706 = vmatmul.mubr.msk.f32.vlgmr.msra.gmra.mrb[0].mxu1 %vm128_vm3, %v116_v47 }
 0x158   :  { %854 = vmatpush3.bf16.msra.mxu1 %v1014_v5  ;;  %740 = vmatprep.mubr.msk.f32.mxu1 %vm973_vm0, %v974_v8  ;;  %v570_v5 = vld [vmem:[%s1221_s2 + $0x98] sm:$0xff] }
 0x159   :  { %855 = vmatprep.subr.bf16.mxu1 %v972_v4 }
 0x15c   :  { %857 = vmatpush3.bf16.msra.mxu1 %v1025_v9  ;;  %v916_v9 = vpack.c.bf16 %v570_v5, %v569_v3 }
 0x15d   :  { %858 = vmatprep.subr.bf16.mxu1 %v972_v4 }
 0x160   :  { %860 = vmatpush3.bf16.msra.mxu1 %v1050_v18 }
 0x161   :  { %861 = vmatprep.subr.bf16.mxu1 %v972_v4 }
 0x164   :  { %863 = vmatpush3.bf16.msra.mxu1 %v1067_v25 }
 0x165   :  { %864 = vmatprep.subr.bf16.mxu1 %v972_v4 }
 0x168   :  { %866 = vmatpush3.bf16.msra.mxu1 %v829_v31 }
 0x169   :  { %867 = vmatprep.subr.bf16.mxu1 %v972_v4 }
 0x16c   :  { %869 = vmatpush3.bf16.msra.mxu1 %v832_v35 }
 0x16d   :  { %870 = vmatprep.subr.bf16.mxu1 %v972_v4 }
 0x170   :  { %872 = vmatpush3.bf16.msra.mxu1 %v835_v38 }
 0x171   :  { %873 = vmatprep.subr.bf16.mxu1 %v972_v4 }
 0x174   :  { %875 = vmatpush3.bf16.msra.mxu1 %v838_v41 }
 0x175   :  { %876 = vmatprep.subr.bf16.mxu1 %v972_v4 }
 0x176   :  { %v434_v62 = vpop.f32.mrb[2].mxu0 }
 0x177   :  { %741 = vmatmul.mubr.msk.f32.vlgmr.msra.gmra.mrb[2].mxu1 %vm206_vm4, %v977_v45  ;;  %v796_v63 = vpop.f32.mrb[3].mxu0 }
 0x178   :  { %878 = vmatpush3.bf16.msra.mxu1 %v877_v52  ;;  %759 = vmatprep.mubr.msk.f32.mxu1 %vm973_vm0, %v974_v8 }
 0x179   :  { %879 = vmatprep.subr.bf16.mxu1 %v972_v4 }
 0x17c   :  { %881 = vmatpush3.bf16.msra.mxu1 %v880_v55 }
 0x17d   :  { %882 = vmatprep.subr.bf16.mxu1 %v972_v4 }
 0x180   :  { %884 = vmatpush3.bf16.msra.mxu1 %v883_v58 }
 0x181   :  { %885 = vmatprep.subr.bf16.mxu1 %v972_v4 }
 0x184   :  { %887 = vmatpush3.bf16.msra.mxu1 %v886_v61 }
 0x185   :  { %912 = vmatprep.subr.bf16.mxu1 %v972_v4 }
 0x24a   :  { %v275_v6 = vpop.f32.mrb[2].mxu1 }
 0x24b   :  { %v742_v7 = vpop.f32.mrb[3].mxu1  ;;  %760 = vmatmul.mubr.msk.f32.vlgmr.msra.gmra.mrb[0].mxu1 %vm128_vm3, %v275_v6 }
 0x24c   :  { %914 = vmatpush3.bf16.msra.mxu1 %v913_v2  ;;  %813 = vmatprep.mubr.msk.f32.mxu1 %vm973_vm0, %v974_v8  ;;  %v574_v8 = vld [vmem:[%s1221_s2 + $0xb8] sm:$0xff]  ;;  %s978_s2 = smov [#allocation2]  }
 0x24d   :  { %915 = vmatprep.subr.bf16.mxu1 %v972_v4  ;;  %v922_v14 = vpack.c.bf16 %v574_v8, %v573_v13  ;;  %s542_s3 = sshll.u32 %s978_s2, 4  ;;  %s543_s3 = int_to_ptr.vmem [resolvable:$true] %s542_s3 }
 0x24e   :  { %s947_s16 = scalar_lea.vmem %s543_s3, 128  ;;  %p952_p1 = scmp.lt.s32.totalorder %s543_s3, %s543_s3 }
 0x24f   :  { %p948_p0 = scmp.ne.s32.totalorder %s543_s3, %s947_s16  ;;  %p953_p2 = scmp.lt.s32.totalorder %s947_s16, %s947_s16 }
 0x250   :  { %917 = vmatpush3.bf16.msra.mxu1 %v916_v9 }
 0x251   :  { %918 = vmatprep.subr.bf16.mxu1 %v972_v4  ;;  %p954_p3 = por %p953_p2, %p952_p1 }
 0x253   :  { %p955_p4 = pnand %p954_p3, %p948_p0 }
 0x254   :  { %920 = vmatpush3.bf16.msra.mxu1 %v919_v12 }
 0x255   :  { %921 = vmatprep.subr.bf16.mxu1 %v972_v4 }
 0x258   :  { %923 = vmatpush3.bf16.msra.mxu1 %v922_v14 }
 0x25b   :  { %814 = vmatmul.mubr.msk.f32.vlgmr.msra.gmra.mrb[0].mxu1 %vm128_vm3, %v434_v62 }
 0x32e   :  { %v516_v16 = vpop.f32.mrb[0].mxu1 }
 0x32f   :  { %v924_v17 = vadd.f32 %v550_v15, %v516_v16  ;;  %v815_v18 = vpop.f32.mrb[1].mxu1 }
 0x331   :  { %941 = vtanh.f32 %v924_v17 }
 0x33b   :  { %v942_v19 = vpop.eup %941 }
 0x33c   :  { %v523_v20 = vsel %vm522_vm5, %v942_v19, -inf }
 0x33d   :  { %524 = vmax.xlane.f32.xlu1 %v523_v20 }
 0x3ca   :  { %v525_v21 = vpop.xlane.xlu1 %524 }
 0x3cb   :  { %v526_v22 = vsub.f32 %v523_v20, %v525_v21 }
 0x3cd   :  { %v527_v23 = vmul.f32 1.442695, %v526_v22 }
 0x3cf   :  { %943 = vpow2.f32 %v527_v23 }
 0x3d9   :  { %v944_v4 = vpop.eup %943 }
 0x3da   :  { %529 = vadd.xlane.f32.xlu0 %v944_v4 }
 0x467   :  { %v530_v24 = vpop.xlane.xlu0 %529 }
 0x468   :  { %945 = vlog2.f32 %v530_v24 }
 0x472   :  { %v946_v25 = vpop.eup %945 }
 0x473   :  { %v532_v26 = vmul.f32 0.6931472, %v946_v25 }
 0x475   :  { %v533_v27 = vadd.f32 %v532_v26, %v525_v21 }
 0x477   :  { %v534_v28 = vsub.f32 %v523_v20, %v533_v27 }
 0x479   :  { %535 = vst [vmem:[#allocation2] sm:$0xff] %v534_v28 }
 0x47a   :  { %958 = shalt.err (!%p955_p4)
}
 0x47b   :  { %s959_s19 = scalar_lea.hbm %s1223_s4, 128 }
 0x47c   :  { %p960_p5 = scmp.ne.s32.totalorder %s1223_s4, %s959_s19  ;;  %p963_p6 = scmp.lt.u32.totalorder %s959_s19, %s1223_s4 }
 0x47e   :  { %p965_p7 = pnand %p963_p6, %p960_p5 }
 0x480   :  { %968 = shalt.err (!%p965_p7)
}
 0x481   :  { %545 = dma.vmem_to_hbm [thread:$0]  %s543_s3, 128, %s1223_s4, [#allocation3]  }
 0x482   :  { %969 = dma.done.wait [#allocation3], 128  }
 0x483   :  { %970 = vsyncadd [#allocation3], 4294967168 }
 0x484   :  { %549 = vsyncpa [#allocation3], 1 }

</bundles_post_ra>
